<compile_context>
chip_gen: v6e
topology: v6e:2x2x1
jax: 0.10.0
libtpu: 0.0.40
codegen_flags: <defaults>
</compile_context>

<pallas_src>
import functools

import jax
import jax.numpy as jnp
import numpy as np
from jax import lax
from jax.experimental import pallas as pl
from jax.experimental.pallas import tpu as pltpu

N_EMBED = 32
N_HEAD = 4
HEAD_SIZE = N_EMBED // N_HEAD
BLOCK_SIZE = 8  # max sequence length
LN_EPS = 1e-5


def _layernorm(v, gamma, beta):
    mu = jnp.mean(v, axis=-1, keepdims=True)
    var = jnp.mean((v - mu) ** 2, axis=-1, keepdims=True)
    return (v - mu) * lax.rsqrt(var + LN_EPS) * gamma + beta


def block_kernel(x_ref, w_ref, v_ref, o_ref, *, n_head):
    bb, T, C = x_ref.shape
    hs = C // n_head
    n = bb * T

    # (bb, T, C) -> (bb*T, C): leading-dim merge, layout no-op.
    x = x_ref[...].astype(jnp.float32).reshape(n, C)

    # ---- packed parameter views (static ref slices) ----
    w_qkv = w_ref[0:C, :]                 # (C, 3C)  [wq | wk | wv]
    w_o = w_ref[C:2 * C, 0:C]             # (C, C)
    w_1 = w_ref[2 * C:3 * C, 0:C]         # (C, C)
    w_2 = w_ref[3 * C:4 * C, 0:C]         # (C, C)
    b_o = v_ref[0:1, :]
    b_1 = v_ref[1:2, :]
    b_2 = v_ref[2:3, :]
    g1 = v_ref[3:4, :]
    be1 = v_ref[4:5, :]
    g2 = v_ref[5:6, :]
    be2 = v_ref[6:7, :]

    # ---- ln1 + fused QKV projection ----
    h1 = _layernorm(x, g1, be1)                                    # (n, C)
    qkv = jnp.dot(h1, w_qkv, preferred_element_type=jnp.float32)   # (n, 3C)

    # Causal mask built once, additive form, broadcast over the batch block.
    row = lax.broadcasted_iota(jnp.int32, (T, T), 0)
    col = lax.broadcasted_iota(jnp.int32, (T, T), 1)
    mask_bias = jnp.where(col <= row, 0.0, -jnp.inf).astype(jnp.float32)

    scale = float(C) ** -0.5  # NOTE: source scales by n_embed, not head_size.

    # ---- multi-head causal self-attention, batched over the batch block ----
    sa = jnp.zeros((n, C), jnp.float32)
    for h in range(n_head):
        lo, hi = h * hs, (h + 1) * hs
        qh = qkv[:, lo:hi].reshape(bb, T, hs)              # leading-dim split
        kh = qkv[:, C + lo:C + hi].reshape(bb, T, hs)
        vh = qkv[:, 2 * C + lo:2 * C + hi].reshape(bb, T, hs)

        s = jnp.einsum('bqd,bkd->bqk', qh, kh,
                       preferred_element_type=jnp.float32) * scale
        s = s + mask_bias
        s = s - jnp.max(s, axis=-1, keepdims=True)
        p = jnp.exp(s)
        denom = jnp.sum(p, axis=-1, keepdims=True)
        # approx=True would route to the EUP; kept exact for 1e-4 f32 parity.
        p = p * pl.reciprocal(denom, approx=False)

        oh = jnp.einsum('bqk,bkd->bqd', p, vh,
                        preferred_element_type=jnp.float32)        # (bb, T, hs)
        # Fold output projection: proj(concat) == sum_h o_h @ Wo[rows_h, :]
        sa = sa + jnp.dot(oh.reshape(n, hs), w_o[lo:hi, :],
                          preferred_element_type=jnp.float32)
    sa = sa + b_o

    x = x + sa                                   # residual 1

    # ---- ln2 + feed-forward (Linear -> ReLU -> Linear) ----
    h2 = _layernorm(x, g2, be2)
    f = jnp.dot(h2, w_1, preferred_element_type=jnp.float32) + b_1
    f = jnp.maximum(f, 0.0)
    f = jnp.dot(f, w_2, preferred_element_type=jnp.float32) + b_2

    x = x + f                                    # residual 2
    o_ref[...] = x.reshape(bb, T, C).astype(o_ref.dtype)


def _pack_params(params, c):
    """Pack the 14 small tensors into one weight slab + one vector slab."""
    w_qkv = jnp.concatenate([params["wq"], params["wk"], params["wv"]], axis=1)
    pad3 = lambda w: jnp.pad(w, ((0, 0), (0, 2 * c)))      # (C,C) -> (C,3C)
    w_slab = jnp.concatenate(
        [w_qkv, pad3(params["wo"]), pad3(params["w1"]), pad3(params["w2"])],
        axis=0)                                             # (4C, 3C)
    v_slab = jnp.concatenate(
        [params["bo"], params["b1"], params["b2"],
         params["g1"], params["be1"], params["g2"], params["be2"],
         jnp.zeros((1, c), params["bo"].dtype)], axis=0)    # (8, C)
    return w_slab, v_slab


def block_forward(x, params, *, n_head=N_HEAD, bb_max=256):
    B, T, C = x.shape
    head_size = C // n_head
    w_slab, v_slab = _pack_params(params, C)

    # Batch-block size: big blocks amortize per-step overhead; keep >= 2
    # parallel grid steps whenever possible so both v7x TensorCores get work.
    bb = min(bb_max, max(1, pl.cdiv(B, 2)))
    Bp = pl.cdiv(B, bb) * bb
    xp = x if Bp == B else jnp.pad(x, ((0, Bp - B), (0, 0), (0, 0)))
    grid = Bp // bb

    in_specs = [
        pl.BlockSpec((bb, T, C), lambda i: (i, 0, 0)),       # x batch block
        pl.BlockSpec((4 * C, 3 * C), lambda i: (0, 0)),      # packed weights
        pl.BlockSpec((8, C), lambda i: (0, 0)),              # packed vectors
    ]
    out_spec = pl.BlockSpec((bb, T, C), lambda i: (i, 0, 0))

    n_tok = Bp * T
    flops = (2 * n_tok * C * 3 * C                       # fused QKV proj
             + 4 * Bp * n_head * T * T * head_size       # qk^T + att@v
             + 2 * n_tok * C * C                         # output proj
             + 4 * n_tok * C * C)                        # two FFN linears
    cost = pl.CostEstimate(
        flops=flops,
        transcendentals=Bp * n_head * T * T + 2 * n_tok,
        bytes_accessed=2 * xp.size * 4 + grid * (w_slab.size + v_slab.size) * 4,
    )

    out = pl.pallas_call(
        functools.partial(block_kernel, n_head=n_head),
        out_shape=jax.ShapeDtypeStruct((Bp, T, C), x.dtype),
        grid_spec=pltpu.PrefetchScalarGridSpec(
            num_scalar_prefetch=0,
            grid=(grid,),
            in_specs=in_specs,
            out_specs=out_spec,
        ),
        compiler_params=pltpu.CompilerParams(
            dimension_semantics=("parallel",)),
        cost_estimate=cost,
    )(xp, w_slab, v_slab)
    return out[:B] if Bp != B else out


def block_reference(x, params):
    """Pure-JAX reference matching the PyTorch forward (eval mode)."""
    C = x.shape[-1]
    h1 = _layernorm(x, params["g1"][0], params["be1"][0])
    q = h1 @ params["wq"]
    k = h1 @ params["wk"]
    v = h1 @ params["wv"]
    T = x.shape[1]
    tril = jnp.tril(jnp.ones((T, T)))
    heads = []
    for h in range(N_HEAD):
        s = slice(h * HEAD_SIZE, (h + 1) * HEAD_SIZE)
        w = q[..., s] @ jnp.swapaxes(k[..., s], -1, -2) * (C ** -0.5)
        w = jnp.where(tril == 0, -jnp.inf, w)
        w = jax.nn.softmax(w, axis=-1)
        heads.append(w @ v[..., s])
    sa = jnp.concatenate(heads, axis=-1) @ params["wo"] + params["bo"][0]
    x = x + sa
    h2 = _layernorm(x, params["g2"][0], params["be2"][0])
    f = jnp.maximum(h2 @ params["w1"] + params["b1"][0], 0.0) @ params["w2"] + params["b2"][0]
    return x + f


def init_params(key, c=N_EMBED):
    ks = jax.random.split(key, 12)
    s = 0.1
    return {
        "wq": s * jax.random.normal(ks[0], (c, c), jnp.float32),
        "wk": s * jax.random.normal(ks[1], (c, c), jnp.float32),
        "wv": s * jax.random.normal(ks[2], (c, c), jnp.float32),
        "wo": s * jax.random.normal(ks[3], (c, c), jnp.float32),
        "bo": s * jax.random.normal(ks[4], (1, c), jnp.float32),
        "w1": s * jax.random.normal(ks[5], (c, c), jnp.float32),
        "b1": s * jax.random.normal(ks[6], (1, c), jnp.float32),
        "w2": s * jax.random.normal(ks[7], (c, c), jnp.float32),
        "b2": s * jax.random.normal(ks[8], (1, c), jnp.float32),
        "g1": jnp.ones((1, c), jnp.float32),
        "be1": jnp.zeros((1, c), jnp.float32),
        "g2": jnp.ones((1, c), jnp.float32),
        "be2": jnp.zeros((1, c), jnp.float32),
    }


if __name__ == "__main__":
    key = jax.random.PRNGKey(0)
    k_x, k_p = jax.random.split(key)
    T, C = BLOCK_SIZE, N_EMBED
    params = init_params(k_p, C)

    # Small canonical test (B=2) + a padded/multi-step test (B=5, grid of 2).
    for B in (2, 5):
        x = jax.random.normal(jax.random.fold_in(k_x, B), (B, T, C), jnp.float32)
        out = jax.block_until_ready(block_forward(x, params))
        ref = block_reference(x, params)
        np.testing.assert_allclose(np.asarray(out), np.asarray(ref),
                                   rtol=1e-4, atol=1e-4)

    print("KERNEL_OK")
</pallas_src>

<mosaic_0001>
module attributes {stable_mosaic.version = 11 : i64} {
  func.func @block_kernel(%arg0: i32, %arg1: memref<1x8x32xf32, #tpu.memory_space<vmem>>, %arg2: memref<128x96xf32, #tpu.memory_space<vmem>>, %arg3: memref<8x32xf32, #tpu.memory_space<vmem>>, %arg4: memref<1x8x32xf32, #tpu.memory_space<vmem>>) attributes {dimension_semantics = [#tpu.dimension_semantics<parallel>], iteration_bounds = array<i64: 2>, scalar_prefetch = 0 : i64, scratch_operands = 0 : i64, tpu.core_type = #tpu.core_type<tc>, window_params = [{transform_indices = @transform_0, window_bounds = array<i64: 1, 8, 32>}, {pipeline_mode = #tpu.pipeline_mode<synchronous>, transform_indices = @transform_1, window_bounds = array<i64: 128, 96>}, {pipeline_mode = #tpu.pipeline_mode<synchronous>, transform_indices = @transform_2, window_bounds = array<i64: 8, 32>}, {transform_indices = @transform_3, window_bounds = array<i64: 1, 8, 32>}]} {
    %c0 = arith.constant 0 : index
    %c0_0 = arith.constant 0 : index
    %c0_1 = arith.constant 0 : index
    %0 = vector.load %arg1[%c0, %c0_0, %c0_1] : memref<1x8x32xf32, #tpu.memory_space<vmem>>, vector<1x8x32xf32>
    %1 = vector.shape_cast %0 : vector<1x8x32xf32> to vector<8x32xf32>
    %c0_2 = arith.constant 0 : index
    %c0_3 = arith.constant 0 : index
    %2 = vector.load %arg2[%c0_2, %c0_3] : memref<128x96xf32, #tpu.memory_space<vmem>>, vector<32x96xf32>
    %c32 = arith.constant 32 : index
    %c0_4 = arith.constant 0 : index
    %3 = vector.load %arg2[%c32, %c0_4] : memref<128x96xf32, #tpu.memory_space<vmem>>, vector<32x32xf32>
    %c64 = arith.constant 64 : index
    %c0_5 = arith.constant 0 : index
    %4 = vector.load %arg2[%c64, %c0_5] : memref<128x96xf32, #tpu.memory_space<vmem>>, vector<32x32xf32>
    %c96 = arith.constant 96 : index
    %c0_6 = arith.constant 0 : index
    %5 = vector.load %arg2[%c96, %c0_6] : memref<128x96xf32, #tpu.memory_space<vmem>>, vector<32x32xf32>
    %c0_7 = arith.constant 0 : index
    %c0_8 = arith.constant 0 : index
    %6 = vector.load %arg3[%c0_7, %c0_8] : memref<8x32xf32, #tpu.memory_space<vmem>>, vector<1x32xf32>
    %c1 = arith.constant 1 : index
    %c0_9 = arith.constant 0 : index
    %7 = vector.load %arg3[%c1, %c0_9] : memref<8x32xf32, #tpu.memory_space<vmem>>, vector<1x32xf32>
    %c2 = arith.constant 2 : index
    %c0_10 = arith.constant 0 : index
    %8 = vector.load %arg3[%c2, %c0_10] : memref<8x32xf32, #tpu.memory_space<vmem>>, vector<1x32xf32>
    %c3 = arith.constant 3 : index
    %c0_11 = arith.constant 0 : index
    %9 = vector.load %arg3[%c3, %c0_11] : memref<8x32xf32, #tpu.memory_space<vmem>>, vector<1x32xf32>
    %c4 = arith.constant 4 : index
    %c0_12 = arith.constant 0 : index
    %10 = vector.load %arg3[%c4, %c0_12] : memref<8x32xf32, #tpu.memory_space<vmem>>, vector<1x32xf32>
    %c5 = arith.constant 5 : index
    %c0_13 = arith.constant 0 : index
    %11 = vector.load %arg3[%c5, %c0_13] : memref<8x32xf32, #tpu.memory_space<vmem>>, vector<1x32xf32>
    %c6 = arith.constant 6 : index
    %c0_14 = arith.constant 0 : index
    %12 = vector.load %arg3[%c6, %c0_14] : memref<8x32xf32, #tpu.memory_space<vmem>>, vector<1x32xf32>
    %cst = arith.constant dense<0.000000e+00> : vector<8xf32>
    %13 = vector.multi_reduction <add>, %1, %cst [1] : vector<8x32xf32> to vector<8xf32>
    %14 = vector.shape_cast %13 : vector<8xf32> to vector<8x1xf32>
    %cst_15 = arith.constant 3.200000e+01 : f32
    %15 = vector.broadcast %cst_15 : f32 to vector<8x1xf32>
    %16 = arith.divf %14, %15 : vector<8x1xf32>
    %17 = vector.broadcast %16 : vector<8x1xf32> to vector<8x32xf32>
    %18 = arith.subf %1, %17 : vector<8x32xf32>
    %19 = arith.mulf %18, %18 : vector<8x32xf32>
    %cst_16 = arith.constant dense<0.000000e+00> : vector<8xf32>
    %20 = vector.multi_reduction <add>, %19, %cst_16 [1] : vector<8x32xf32> to vector<8xf32>
    %21 = vector.shape_cast %20 : vector<8xf32> to vector<8x1xf32>
    %cst_17 = arith.constant 3.200000e+01 : f32
    %22 = vector.broadcast %cst_17 : f32 to vector<8x1xf32>
    %23 = arith.divf %21, %22 : vector<8x1xf32>
    %24 = vector.broadcast %16 : vector<8x1xf32> to vector<8x32xf32>
    %25 = arith.subf %1, %24 : vector<8x32xf32>
    %cst_18 = arith.constant 9.99999974E-6 : f32
    %26 = vector.broadcast %cst_18 : f32 to vector<8x1xf32>
    %27 = arith.addf %23, %26 : vector<8x1xf32>
    %28 = math.rsqrt %27 : vector<8x1xf32>
    %29 = vector.broadcast %28 : vector<8x1xf32> to vector<8x32xf32>
    %30 = arith.mulf %25, %29 : vector<8x32xf32>
    %31 = vector.broadcast %9 : vector<1x32xf32> to vector<8x32xf32>
    %32 = arith.mulf %30, %31 : vector<8x32xf32>
    %33 = vector.broadcast %10 : vector<1x32xf32> to vector<8x32xf32>
    %34 = arith.addf %32, %33 : vector<8x32xf32>
    %cst_19 = arith.constant dense<0.000000e+00> : vector<8x96xf32>
    %35 = tpu.matmul %34, %2, %cst_19 {dimension_numbers = #tpu.dot_dimension_numbers<[1], [0], [0], [1], [0, 0, 1, 1], [], []>} : vector<8x32xf32>, vector<32x96xf32>, vector<8x96xf32> -> vector<8x96xf32>
    %36 = tpu.iota {dimensions = array<i32: 0>} : vector<8x8xi32>
    %37 = tpu.iota {dimensions = array<i32: 1>} : vector<8x8xi32>
    %38 = arith.cmpi sle, %37, %36 : vector<8x8xi32>
    %cst_20 = arith.constant 0.000000e+00 : f32
    %cst_21 = arith.constant 0xFF800000 : f32
    %39 = vector.broadcast %cst_20 : f32 to vector<8x8xf32>
    %40 = vector.broadcast %cst_21 : f32 to vector<8x8xf32>
    %41 = arith.select %38, %39, %40 : vector<8x8xi1>, vector<8x8xf32>
    %cst_22 = arith.constant 0.000000e+00 : f32
    %42 = vector.broadcast %cst_22 : f32 to vector<8x32xf32>
    %43 = vector.extract_strided_slice %35 {offsets = [0, 0], sizes = [8, 8], strides = [1, 1]} : vector<8x96xf32> to vector<8x8xf32>
    %44 = vector.shape_cast %43 : vector<8x8xf32> to vector<1x8x8xf32>
    %45 = vector.extract_strided_slice %35 {offsets = [0, 32], sizes = [8, 8], strides = [1, 1]} : vector<8x96xf32> to vector<8x8xf32>
    %46 = vector.shape_cast %45 : vector<8x8xf32> to vector<1x8x8xf32>
    %47 = vector.extract_strided_slice %35 {offsets = [0, 64], sizes = [8, 8], strides = [1, 1]} : vector<8x96xf32> to vector<8x8xf32>
    %48 = vector.shape_cast %47 : vector<8x8xf32> to vector<1x8x8xf32>
    "tpu.trace_start"() <{level = 10 : i32, message = "bqd,bkd->bqk"}> : () -> ()
    %cst_23 = arith.constant dense<0.000000e+00> : vector<1x8x8xf32>
    %49 = tpu.matmul %44, %46, %cst_23 {dimension_numbers = #tpu.dot_dimension_numbers<[2], [2], [1], [1], [0, 0, 0, 1, 1, 1], [0], [0]>} : vector<1x8x8xf32>, vector<1x8x8xf32>, vector<1x8x8xf32> -> vector<1x8x8xf32>
    "tpu.trace_stop"() : () -> ()
    %cst_24 = arith.constant 0.176776692 : f32
    %50 = vector.broadcast %cst_24 : f32 to vector<1x8x8xf32>
    %51 = arith.mulf %49, %50 : vector<1x8x8xf32>
    %52 = vector.shape_cast %41 : vector<8x8xf32> to vector<1x8x8xf32>
    %53 = arith.addf %51, %52 : vector<1x8x8xf32>
    %cst_25 = arith.constant dense<0xFF800000> : vector<1x8xf32>
    %54 = vector.multi_reduction <maximumf>, %53, %cst_25 [2] : vector<1x8x8xf32> to vector<1x8xf32>
    %55 = vector.shape_cast %54 : vector<1x8xf32> to vector<1x8x1xf32>
    %56 = vector.broadcast %55 : vector<1x8x1xf32> to vector<1x8x8xf32>
    %57 = arith.subf %53, %56 : vector<1x8x8xf32>
    %58 = math.exp %57 : vector<1x8x8xf32>
    %cst_26 = arith.constant dense<0.000000e+00> : vector<1x8xf32>
    %59 = vector.multi_reduction <add>, %58, %cst_26 [2] : vector<1x8x8xf32> to vector<1x8xf32>
    %60 = vector.shape_cast %59 : vector<1x8xf32> to vector<1x8x1xf32>
    %61 = tpu.reciprocal %60 : vector<1x8x1xf32> -> vector<1x8x1xf32>
    %62 = vector.broadcast %61 : vector<1x8x1xf32> to vector<1x8x8xf32>
    %63 = arith.mulf %58, %62 : vector<1x8x8xf32>
    "tpu.trace_start"() <{level = 10 : i32, message = "bqk,bkd->bqd"}> : () -> ()
    %cst_27 = arith.constant dense<0.000000e+00> : vector<1x8x8xf32>
    %64 = tpu.matmul %63, %48, %cst_27 {dimension_numbers = #tpu.dot_dimension_numbers<[2], [1], [1], [2], [0, 0, 0, 1, 1, 2], [0], [0]>} : vector<1x8x8xf32>, vector<1x8x8xf32>, vector<1x8x8xf32> -> vector<1x8x8xf32>
    "tpu.trace_stop"() : () -> ()
    %65 = vector.shape_cast %64 : vector<1x8x8xf32> to vector<8x8xf32>
    %66 = vector.extract_strided_slice %3 {offsets = [0, 0], sizes = [8, 32], strides = [1, 1]} : vector<32x32xf32> to vector<8x32xf32>
    %cst_28 = arith.constant dense<0.000000e+00> : vector<8x32xf32>
    %67 = tpu.matmul %65, %66, %cst_28 {dimension_numbers = #tpu.dot_dimension_numbers<[1], [0], [0], [1], [0, 0, 1, 1], [], []>} : vector<8x8xf32>, vector<8x32xf32>, vector<8x32xf32> -> vector<8x32xf32>
    %68 = arith.addf %42, %67 : vector<8x32xf32>
    %69 = vector.extract_strided_slice %35 {offsets = [0, 8], sizes = [8, 8], strides = [1, 1]} : vector<8x96xf32> to vector<8x8xf32>
    %70 = vector.shape_cast %69 : vector<8x8xf32> to vector<1x8x8xf32>
    %71 = vector.extract_strided_slice %35 {offsets = [0, 40], sizes = [8, 8], strides = [1, 1]} : vector<8x96xf32> to vector<8x8xf32>
    %72 = vector.shape_cast %71 : vector<8x8xf32> to vector<1x8x8xf32>
    %73 = vector.extract_strided_slice %35 {offsets = [0, 72], sizes = [8, 8], strides = [1, 1]} : vector<8x96xf32> to vector<8x8xf32>
    %74 = vector.shape_cast %73 : vector<8x8xf32> to vector<1x8x8xf32>
    "tpu.trace_start"() <{level = 10 : i32, message = "bqd,bkd->bqk"}> : () -> ()
    %cst_29 = arith.constant dense<0.000000e+00> : vector<1x8x8xf32>
    %75 = tpu.matmul %70, %72, %cst_29 {dimension_numbers = #tpu.dot_dimension_numbers<[2], [2], [1], [1], [0, 0, 0, 1, 1, 1], [0], [0]>} : vector<1x8x8xf32>, vector<1x8x8xf32>, vector<1x8x8xf32> -> vector<1x8x8xf32>
    "tpu.trace_stop"() : () -> ()
    %cst_30 = arith.constant 0.176776692 : f32
    %76 = vector.broadcast %cst_30 : f32 to vector<1x8x8xf32>
    %77 = arith.mulf %75, %76 : vector<1x8x8xf32>
    %78 = vector.shape_cast %41 : vector<8x8xf32> to vector<1x8x8xf32>
    %79 = arith.addf %77, %78 : vector<1x8x8xf32>
    %cst_31 = arith.constant dense<0xFF800000> : vector<1x8xf32>
    %80 = vector.multi_reduction <maximumf>, %79, %cst_31 [2] : vector<1x8x8xf32> to vector<1x8xf32>
    %81 = vector.shape_cast %80 : vector<1x8xf32> to vector<1x8x1xf32>
    %82 = vector.broadcast %81 : vector<1x8x1xf32> to vector<1x8x8xf32>
    %83 = arith.subf %79, %82 : vector<1x8x8xf32>
    %84 = math.exp %83 : vector<1x8x8xf32>
    %cst_32 = arith.constant dense<0.000000e+00> : vector<1x8xf32>
    %85 = vector.multi_reduction <add>, %84, %cst_32 [2] : vector<1x8x8xf32> to vector<1x8xf32>
    %86 = vector.shape_cast %85 : vector<1x8xf32> to vector<1x8x1xf32>
    %87 = tpu.reciprocal %86 : vector<1x8x1xf32> -> vector<1x8x1xf32>
    %88 = vector.broadcast %87 : vector<1x8x1xf32> to vector<1x8x8xf32>
    %89 = arith.mulf %84, %88 : vector<1x8x8xf32>
    "tpu.trace_start"() <{level = 10 : i32, message = "bqk,bkd->bqd"}> : () -> ()
    %cst_33 = arith.constant dense<0.000000e+00> : vector<1x8x8xf32>
    %90 = tpu.matmul %89, %74, %cst_33 {dimension_numbers = #tpu.dot_dimension_numbers<[2], [1], [1], [2], [0, 0, 0, 1, 1, 2], [0], [0]>} : vector<1x8x8xf32>, vector<1x8x8xf32>, vector<1x8x8xf32> -> vector<1x8x8xf32>
    "tpu.trace_stop"() : () -> ()
    %91 = vector.shape_cast %90 : vector<1x8x8xf32> to vector<8x8xf32>
    %92 = vector.extract_strided_slice %3 {offsets = [8, 0], sizes = [8, 32], strides = [1, 1]} : vector<32x32xf32> to vector<8x32xf32>
    %cst_34 = arith.constant dense<0.000000e+00> : vector<8x32xf32>
    %93 = tpu.matmul %91, %92, %cst_34 {dimension_numbers = #tpu.dot_dimension_numbers<[1], [0], [0], [1], [0, 0, 1, 1], [], []>} : vector<8x8xf32>, vector<8x32xf32>, vector<8x32xf32> -> vector<8x32xf32>
    %94 = arith.addf %68, %93 : vector<8x32xf32>
    %95 = vector.extract_strided_slice %35 {offsets = [0, 16], sizes = [8, 8], strides = [1, 1]} : vector<8x96xf32> to vector<8x8xf32>
    %96 = vector.shape_cast %95 : vector<8x8xf32> to vector<1x8x8xf32>
    %97 = vector.extract_strided_slice %35 {offsets = [0, 48], sizes = [8, 8], strides = [1, 1]} : vector<8x96xf32> to vector<8x8xf32>
    %98 = vector.shape_cast %97 : vector<8x8xf32> to vector<1x8x8xf32>
    %99 = vector.extract_strided_slice %35 {offsets = [0, 80], sizes = [8, 8], strides = [1, 1]} : vector<8x96xf32> to vector<8x8xf32>
    %100 = vector.shape_cast %99 : vector<8x8xf32> to vector<1x8x8xf32>
    "tpu.trace_start"() <{level = 10 : i32, message = "bqd,bkd->bqk"}> : () -> ()
    %cst_35 = arith.constant dense<0.000000e+00> : vector<1x8x8xf32>
    %101 = tpu.matmul %96, %98, %cst_35 {dimension_numbers = #tpu.dot_dimension_numbers<[2], [2], [1], [1], [0, 0, 0, 1, 1, 1], [0], [0]>} : vector<1x8x8xf32>, vector<1x8x8xf32>, vector<1x8x8xf32> -> vector<1x8x8xf32>
    "tpu.trace_stop"() : () -> ()
    %cst_36 = arith.constant 0.176776692 : f32
    %102 = vector.broadcast %cst_36 : f32 to vector<1x8x8xf32>
    %103 = arith.mulf %101, %102 : vector<1x8x8xf32>
    %104 = vector.shape_cast %41 : vector<8x8xf32> to vector<1x8x8xf32>
    %105 = arith.addf %103, %104 : vector<1x8x8xf32>
    %cst_37 = arith.constant dense<0xFF800000> : vector<1x8xf32>
    %106 = vector.multi_reduction <maximumf>, %105, %cst_37 [2] : vector<1x8x8xf32> to vector<1x8xf32>
    %107 = vector.shape_cast %106 : vector<1x8xf32> to vector<1x8x1xf32>
    %108 = vector.broadcast %107 : vector<1x8x1xf32> to vector<1x8x8xf32>
    %109 = arith.subf %105, %108 : vector<1x8x8xf32>
    %110 = math.exp %109 : vector<1x8x8xf32>
    %cst_38 = arith.constant dense<0.000000e+00> : vector<1x8xf32>
    %111 = vector.multi_reduction <add>, %110, %cst_38 [2] : vector<1x8x8xf32> to vector<1x8xf32>
    %112 = vector.shape_cast %111 : vector<1x8xf32> to vector<1x8x1xf32>
    %113 = tpu.reciprocal %112 : vector<1x8x1xf32> -> vector<1x8x1xf32>
    %114 = vector.broadcast %113 : vector<1x8x1xf32> to vector<1x8x8xf32>
    %115 = arith.mulf %110, %114 : vector<1x8x8xf32>
    "tpu.trace_start"() <{level = 10 : i32, message = "bqk,bkd->bqd"}> : () -> ()
    %cst_39 = arith.constant dense<0.000000e+00> : vector<1x8x8xf32>
    %116 = tpu.matmul %115, %100, %cst_39 {dimension_numbers = #tpu.dot_dimension_numbers<[2], [1], [1], [2], [0, 0, 0, 1, 1, 2], [0], [0]>} : vector<1x8x8xf32>, vector<1x8x8xf32>, vector<1x8x8xf32> -> vector<1x8x8xf32>
    "tpu.trace_stop"() : () -> ()
    %117 = vector.shape_cast %116 : vector<1x8x8xf32> to vector<8x8xf32>
    %118 = vector.extract_strided_slice %3 {offsets = [16, 0], sizes = [8, 32], strides = [1, 1]} : vector<32x32xf32> to vector<8x32xf32>
    %cst_40 = arith.constant dense<0.000000e+00> : vector<8x32xf32>
    %119 = tpu.matmul %117, %118, %cst_40 {dimension_numbers = #tpu.dot_dimension_numbers<[1], [0], [0], [1], [0, 0, 1, 1], [], []>} : vector<8x8xf32>, vector<8x32xf32>, vector<8x32xf32> -> vector<8x32xf32>
    %120 = arith.addf %94, %119 : vector<8x32xf32>
    %121 = vector.extract_strided_slice %35 {offsets = [0, 24], sizes = [8, 8], strides = [1, 1]} : vector<8x96xf32> to vector<8x8xf32>
    %122 = vector.shape_cast %121 : vector<8x8xf32> to vector<1x8x8xf32>
    %123 = vector.extract_strided_slice %35 {offsets = [0, 56], sizes = [8, 8], strides = [1, 1]} : vector<8x96xf32> to vector<8x8xf32>
    %124 = vector.shape_cast %123 : vector<8x8xf32> to vector<1x8x8xf32>
    %125 = vector.extract_strided_slice %35 {offsets = [0, 88], sizes = [8, 8], strides = [1, 1]} : vector<8x96xf32> to vector<8x8xf32>
    %126 = vector.shape_cast %125 : vector<8x8xf32> to vector<1x8x8xf32>
    "tpu.trace_start"() <{level = 10 : i32, message = "bqd,bkd->bqk"}> : () -> ()
    %cst_41 = arith.constant dense<0.000000e+00> : vector<1x8x8xf32>
    %127 = tpu.matmul %122, %124, %cst_41 {dimension_numbers = #tpu.dot_dimension_numbers<[2], [2], [1], [1], [0, 0, 0, 1, 1, 1], [0], [0]>} : vector<1x8x8xf32>, vector<1x8x8xf32>, vector<1x8x8xf32> -> vector<1x8x8xf32>
    "tpu.trace_stop"() : () -> ()
    %cst_42 = arith.constant 0.176776692 : f32
    %128 = vector.broadcast %cst_42 : f32 to vector<1x8x8xf32>
    %129 = arith.mulf %127, %128 : vector<1x8x8xf32>
    %130 = vector.shape_cast %41 : vector<8x8xf32> to vector<1x8x8xf32>
    %131 = arith.addf %129, %130 : vector<1x8x8xf32>
    %cst_43 = arith.constant dense<0xFF800000> : vector<1x8xf32>
    %132 = vector.multi_reduction <maximumf>, %131, %cst_43 [2] : vector<1x8x8xf32> to vector<1x8xf32>
    %133 = vector.shape_cast %132 : vector<1x8xf32> to vector<1x8x1xf32>
    %134 = vector.broadcast %133 : vector<1x8x1xf32> to vector<1x8x8xf32>
    %135 = arith.subf %131, %134 : vector<1x8x8xf32>
    %136 = math.exp %135 : vector<1x8x8xf32>
    %cst_44 = arith.constant dense<0.000000e+00> : vector<1x8xf32>
    %137 = vector.multi_reduction <add>, %136, %cst_44 [2] : vector<1x8x8xf32> to vector<1x8xf32>
    %138 = vector.shape_cast %137 : vector<1x8xf32> to vector<1x8x1xf32>
    %139 = tpu.reciprocal %138 : vector<1x8x1xf32> -> vector<1x8x1xf32>
    %140 = vector.broadcast %139 : vector<1x8x1xf32> to vector<1x8x8xf32>
    %141 = arith.mulf %136, %140 : vector<1x8x8xf32>
    "tpu.trace_start"() <{level = 10 : i32, message = "bqk,bkd->bqd"}> : () -> ()
    %cst_45 = arith.constant dense<0.000000e+00> : vector<1x8x8xf32>
    %142 = tpu.matmul %141, %126, %cst_45 {dimension_numbers = #tpu.dot_dimension_numbers<[2], [1], [1], [2], [0, 0, 0, 1, 1, 2], [0], [0]>} : vector<1x8x8xf32>, vector<1x8x8xf32>, vector<1x8x8xf32> -> vector<1x8x8xf32>
    "tpu.trace_stop"() : () -> ()
    %143 = vector.shape_cast %142 : vector<1x8x8xf32> to vector<8x8xf32>
    %144 = vector.extract_strided_slice %3 {offsets = [24, 0], sizes = [8, 32], strides = [1, 1]} : vector<32x32xf32> to vector<8x32xf32>
    %cst_46 = arith.constant dense<0.000000e+00> : vector<8x32xf32>
    %145 = tpu.matmul %143, %144, %cst_46 {dimension_numbers = #tpu.dot_dimension_numbers<[1], [0], [0], [1], [0, 0, 1, 1], [], []>} : vector<8x8xf32>, vector<8x32xf32>, vector<8x32xf32> -> vector<8x32xf32>
    %146 = arith.addf %120, %145 : vector<8x32xf32>
    %147 = vector.broadcast %6 : vector<1x32xf32> to vector<8x32xf32>
    %148 = arith.addf %146, %147 : vector<8x32xf32>
    %149 = arith.addf %1, %148 : vector<8x32xf32>
    %cst_47 = arith.constant dense<0.000000e+00> : vector<8xf32>
    %150 = vector.multi_reduction <add>, %149, %cst_47 [1] : vector<8x32xf32> to vector<8xf32>
    %151 = vector.shape_cast %150 : vector<8xf32> to vector<8x1xf32>
    %cst_48 = arith.constant 3.200000e+01 : f32
    %152 = vector.broadcast %cst_48 : f32 to vector<8x1xf32>
    %153 = arith.divf %151, %152 : vector<8x1xf32>
    %154 = vector.broadcast %153 : vector<8x1xf32> to vector<8x32xf32>
    %155 = arith.subf %149, %154 : vector<8x32xf32>
    %156 = arith.mulf %155, %155 : vector<8x32xf32>
    %cst_49 = arith.constant dense<0.000000e+00> : vector<8xf32>
    %157 = vector.multi_reduction <add>, %156, %cst_49 [1] : vector<8x32xf32> to vector<8xf32>
    %158 = vector.shape_cast %157 : vector<8xf32> to vector<8x1xf32>
    %cst_50 = arith.constant 3.200000e+01 : f32
    %159 = vector.broadcast %cst_50 : f32 to vector<8x1xf32>
    %160 = arith.divf %158, %159 : vector<8x1xf32>
    %161 = vector.broadcast %153 : vector<8x1xf32> to vector<8x32xf32>
    %162 = arith.subf %149, %161 : vector<8x32xf32>
    %cst_51 = arith.constant 9.99999974E-6 : f32
    %163 = vector.broadcast %cst_51 : f32 to vector<8x1xf32>
    %164 = arith.addf %160, %163 : vector<8x1xf32>
    %165 = math.rsqrt %164 : vector<8x1xf32>
    %166 = vector.broadcast %165 : vector<8x1xf32> to vector<8x32xf32>
    %167 = arith.mulf %162, %166 : vector<8x32xf32>
    %168 = vector.broadcast %11 : vector<1x32xf32> to vector<8x32xf32>
    %169 = arith.mulf %167, %168 : vector<8x32xf32>
    %170 = vector.broadcast %12 : vector<1x32xf32> to vector<8x32xf32>
    %171 = arith.addf %169, %170 : vector<8x32xf32>
    %cst_52 = arith.constant dense<0.000000e+00> : vector<8x32xf32>
    %172 = tpu.matmul %171, %4, %cst_52 {dimension_numbers = #tpu.dot_dimension_numbers<[1], [0], [0], [1], [0, 0, 1, 1], [], []>} : vector<8x32xf32>, vector<32x32xf32>, vector<8x32xf32> -> vector<8x32xf32>
    %173 = vector.broadcast %7 : vector<1x32xf32> to vector<8x32xf32>
    %174 = arith.addf %172, %173 : vector<8x32xf32>
    %cst_53 = arith.constant 0.000000e+00 : f32
    %175 = vector.broadcast %cst_53 : f32 to vector<8x32xf32>
    %176 = arith.maximumf %174, %175 : vector<8x32xf32>
    %cst_54 = arith.constant dense<0.000000e+00> : vector<8x32xf32>
    %177 = tpu.matmul %176, %5, %cst_54 {dimension_numbers = #tpu.dot_dimension_numbers<[1], [0], [0], [1], [0, 0, 1, 1], [], []>} : vector<8x32xf32>, vector<32x32xf32>, vector<8x32xf32> -> vector<8x32xf32>
    %178 = vector.broadcast %8 : vector<1x32xf32> to vector<8x32xf32>
    %179 = arith.addf %177, %178 : vector<8x32xf32>
    %180 = arith.addf %149, %179 : vector<8x32xf32>
    %181 = vector.shape_cast %180 : vector<8x32xf32> to vector<1x8x32xf32>
    %c0_55 = arith.constant 0 : index
    %c0_56 = arith.constant 0 : index
    %c0_57 = arith.constant 0 : index
    %182 = vector.load %arg4[%c0_55, %c0_56, %c0_57] : memref<1x8x32xf32, #tpu.memory_space<vmem>>, vector<1x8x32xf32>
    tpu.vector_store %arg4[%c0_55, %c0_56, %c0_57], %181 {strides = array<i32>} : memref<1x8x32xf32, #tpu.memory_space<vmem>>, vector<1x8x32xf32>,
    return
  }
  func.func @transform_0(%arg0: i32) -> (i32, i32, i32) {
    %c0_i32 = arith.constant 0 : i32
    %c0_i32_0 = arith.constant 0 : i32
    %c0_i32_1 = arith.constant 0 : i32
    return %arg0, %c0_i32, %c0_i32_0 : i32, i32, i32
  }
  func.func @transform_1(%arg0: i32) -> (i32, i32) {
    %c0_i32 = arith.constant 0 : i32
    %c0_i32_0 = arith.constant 0 : i32
    %c0_i32_1 = arith.constant 0 : i32
    return %c0_i32, %c0_i32_0 : i32, i32
  }
  func.func @transform_2(%arg0: i32) -> (i32, i32) {
    %c0_i32 = arith.constant 0 : i32
    %c0_i32_0 = arith.constant 0 : i32
    %c0_i32_1 = arith.constant 0 : i32
    return %c0_i32, %c0_i32_0 : i32, i32
  }
  func.func @transform_3(%arg0: i32) -> (i32, i32, i32) {
    %c0_i32 = arith.constant 0 : i32
    %c0_i32_0 = arith.constant 0 : i32
    %c0_i32_1 = arith.constant 0 : i32
    return %arg0, %c0_i32, %c0_i32_0 : i32, i32, i32
  }
}

</mosaic_0001>

<bundles_post_ra>
// kernel: tpu_custom_call.1
= control target key start
LH: loop header
LB: loop body
LE: loop exit
PB: predicated region body
PF: predicated region fallthrough
CT: control target
= control target key end

     0   :  { %8 = vsyncpa [#allocation3], 0  ;;  %s2120_s0 = inlined_call_operand.vmem [shape: f32[2,8,32], index: 0, kind: input, shape index: {}]   ;;  %s2121_s1 = inlined_call_operand.vmem [shape: f32[128,96], index: 1, kind: input, shape index: {}]   ;;  %s2122_s2 = inlined_call_operand.vmem [shape: f32[8,32], index: 2, kind: input, shape index: {}]   ;;  %s2123_s3 = inlined_call_operand.hbm [shape: f32[2,8,32], index: 3, kind: output, shape index: {}]  }
   0x1   :  { %10 = vsyncpa [#allocation3 + $0x1], 0  ;;  %s1853_s12 = smov 0   ;;  %s1855_s13 = smov 0  }
   0x2   :  { %s1857_s14 = smov 0   ;;  %s1859_s15 = smov 0  }
   0x3 LB: > { %s1874_s16 = sadd.s32 4294967295, %s1816_s15   ;;  %s1515_s17 = sadd.s32 4294967294, %s1816_s15   ;;  %s1816_s15 = sphi %s1859_s15, %s2129_s15   ;;  %s1812_s14 = sphi %s1857_s14, %s2128_s14   ;;  %s1808_s13 = sphi %s1855_s13, %s2127_s13   ;;  %s1804_s12 = sphi %s1853_s12, %s2126_s12  }
   0x4   : > { %s1878_s18 = sadd.s32 1, %s1816_s15   ;;  %s91_s19 = sadd.s32 1, %s1812_s14 }
   0x5   : > { %s88_s20 = ssub.s32 %s1816_s15, %s1878_s18  ;;  %p101_p0 = scmp.ne.s32.totalorder %s1812_s14, %s1808_s13 }
   0x6   : > { %p89_p1 = scmp.eq.s32.totalorder %s88_s20, 0  ;;  %p102_p2 = scmp.eq.s32.totalorder %s1874_s16, 1 }
   0x7   : > { %p107_p3 = scmp.ne.s32.totalorder %s1808_s13, %s1804_s12  ;;  %p108_p4 = scmp.eq.s32.totalorder %s1515_s17, 1 }
   0x8   : > { %s1889_s21 = scalar_select %p89_p1, %s1812_s14, %s91_s19  }
   0x9   : > { %p1891_p5 = por %p102_p2, %p101_p0  ;;  %p1895_p6 = por %p108_p4, %p107_p3 }
   0xa   : > { %p1518_p7 = scmp.ge.s32.totalorder %s1816_s15, 1  ;;  %p139_p8 = scmp.lt.s32.totalorder %s1816_s15, 3 }
   0xc   : > { %p140_p9 = pnand %p1518_p7, %p139_p8 }
   0xd   : > { %p162_p10 = scmp.lt.s32.totalorder (!%p140_p9), %s1874_s16, 1  ;;  %s1820_s20 = smov (!%p140_p9), 120  }
   0xe   : > { %143 = sbr.rel (%p140_p9) target bundleno = 3482 (0xd9a), region = 32  ;;  %s1824_s26 = smov (!%p140_p9), 56  }
   0xf   : > { %s1825_s27 = smov (!%p140_p9), 64   ;;  %s1827_s29 = smov (!%p140_p9), 112  }
  0x10   : > { %s1828_s7 = smov (!%p140_p9), 48   ;;  %s1829_s8 = smov (!%p140_p9), 104  }
  0x11   : > { %s1830_s9 = smov (!%p140_p9), 72   ;;  %s1831_s17 = smov (!%p140_p9), 40  }
  0x12   : > { %s159_s30 = sand.u32 (!%p140_p9), 1, %s1808_s13  }
  0x13   : > { %s163_s24 = scalar_select %p162_p10, %s1874_s16, 1  ;;  %vm190_vm0 = vcmask 261120   ;;  %v170_v7 = vld [vmem:[%s2121_s1 + $0x18] sm:$0xff]  ;;  %v1818_v8 = vmov 0.0   ;;  %v169_v9 = vld [vmem:[%s2121_s1 + $0x10] sm:$0xff]  ;;  %vm1819_vm1 = vmmov 0   ;;  %v288_v26 = vlaneseq }
  0x14   : > { %1590 = vmatprep.subr.mxu0 %v1818_v8  ;;  %1598 = vmatprep.mubr.msk.f32.mxu0 %vm1819_vm1, %v1818_v8  ;;  %v168_v10 = vld [vmem:[%s2121_s1 + $0x8] sm:$0xff]  ;;  %v167_v11 = vld [vmem:[%s2121_s1] sm:$0xff]  ;;  %vm297_vm2 = vcmask 64512   ;;  %v1823_v30 = vmov -inf   ;;  %s1519_s4 = sshll.u32 %s159_s30, 3  ;;  %s1443_s19 = scalar_lea.sflag [#allocation3], %s159_s30 }
  0x15   : > { %s1520_s25 = sshll.u32 %s163_s24, 3  ;;  %1591 = vmatpush3.msra.mxu0 %v170_v7  ;;  %1601 = vmatprep.subr.mxu1 %v1818_v8  ;;  %v1521_v16 = vld [vmem:[%s2122_s2 + $0x3] ss:$0 sm:$0xff]  ;;  %v1522_v18 = vld [vmem:[%s2122_s2 + $0x4] ss:$0 sm:$0xff]  ;;  %s1821_s24 = smov 96  }
  0x16   : > { %s165_s28 = scalar_lea.vmem %s2120_s0, %s1520_s25  ;;  %1592 = vmatprep.subr.mxu0 %v1818_v8  ;;  %1603 = vmatprep.mubr.msk.f32.mxu1 %vm1819_vm1, %v1818_v8  ;;  %s1822_s25 = smov 88   ;;  %v289_v27 = vshrl.u32 %v288_v26, 7  ;;  %v291_v28 = vand.u32 127, %v288_v26  ;;  %v171_v59 = vld [vmem:[%s2121_s1 + $0x20] sm:$0xff]  ;;  %v172_v60 = vld [vmem:[%s2121_s1 + $0x28] sm:$0xff] }
  0x17   : > { %v1906_v0 = vld [vmem:[%s165_s28] sm:$0xff]  ;;  %1593 = vmatpush3.msra.mxu0 %v169_v9  ;;  %s1826_s28 = smov 80  }
  0x18   : > { %v191_v1 = vsel %vm190_vm0, %v1906_v0, 0.0  ;;  %1594 = vmatprep.subr.mxu0 %v1818_v8  ;;  %vm292_vm3 = vcmp.le.s32.totalorder %v291_v28, %v289_v27  ;;  %v173_v27 = vld [vmem:[%s2121_s1 + $0x30] sm:$0xff] }
  0x19   : > { %192 = vadd.xlane.f32.xlu0 %v191_v1  ;;  %1595 = vmatpush3.msra.mxu0 %v168_v10  ;;  %v1959_v31 = vsel %vm292_vm3, 0.0, %v1823_v30 }
  0x1a   : > { %1596 = vmatprep.subr.mxu0 %v1818_v8 }
  0x1b   : > { %1597 = vmatpush3.msra.mxu0 %v167_v11 }
  0x1c   : > { %1611 = vmatprep.subr.mxu0 %v1818_v8 }
  0xa2   : > { %v193_v2 = vpop.xlane.xlu0 %192 }
  0xa3   : > { %v195_v3 = vmul.f32 0.03125, %v193_v2 }
  0xa5   : > { %v196_v4 = vsub.f32 %v1906_v0, %v195_v3 }
  0xa7   : > { %v197_v5 = vmul.f32 %v196_v4, %v196_v4 }
  0xa9   : > { %v198_v6 = vsel %vm190_vm0, %v197_v5, 0.0 }
  0xaa   : > { %199 = vadd.xlane.f32.xlu0 %v198_v6 }
 0x133   : > { %v200_v12 = vpop.xlane.xlu0 %199 }
 0x134   : > { %v201_v13 = vmul.f32 0.03125, %v200_v12 }
 0x136   : > { %v202_v14 = vadd.f32 1e-05, %v201_v13 }
 0x138   : > { %1736 = vrsqrt.f32 %v202_v14 }
 0x145   : > { %v1737_v15 = vpop.eup %1736 }
 0x146   : > { %v204_v17 = vmul.f32 %v1737_v15, %v196_v4 }
 0x148   : > { %v209_v19 = vmul.f32 %v1521_v16, %v204_v17 }
 0x14a   : > { %v214_v20 = vadd.f32 %v1522_v18, %v209_v19 }
 0x14c   : > { %1599 = vmatmul.mubr.msk.f32.vlgmr.msra.gmra.mxu0 %vm190_vm0, %v214_v20 }
 0x14d   : > { %1613 = vmatprep.mubr.msk.f32.mxu0 %vm1819_vm1, %v1818_v8 }
 0x20c   : > { %v1943_v21 = vpop.f32.mrf.mxu0 }
 0x20d   : > { %461 = vrot.lane.b32.xlu0 %v1943_v21, %s1820_s20  ;;  %295 = vrot.lane.b32.xlu1 %v1943_v21, %s1821_s24  ;;  %s1832_s24 = smov [#allocation2]  }
 0x20e   : > { %v1600_v22 = vpop.f32.mrf.mxu0 }
 0x211   : > { %463 = vrot.lane.b32.xlu1 %v1943_v21, %s1822_s25 }
 0x27f   : > { %v296_v23 = vpop.permute.xlu1 %295  ;;  %v462_v25 = vpop.permute.xlu0 %461 }
 0x280   : > { %1602 = vmatpush3.xpose.msk.msra.mxu1 %vm297_vm2, %v296_v23 }
 0x281   : > { %1606 = vmatprep.subr.mxu1 %v1818_v8 }
 0x283   : > { %1604 = vmatmul.mubr.msk.f32.vlgmr.msra.gmra.mxu1 %vm297_vm2, %v1943_v21  ;;  %v464_v24 = vpop.permute.xlu1 %463 }
 0x284   : > { %1612 = vmatpush3.xpose.msk.msra.mxu0 %vm297_vm2, %v464_v24  ;;  %1608 = vmatprep.mubr.msk.f32.mxu1 %vm1819_vm1, %v1818_v8 }
 0x285   : > { %1621 = vmatprep.subr.mxu0 %v1818_v8 }
 0x287   : > { %1614 = vmatmul.mubr.msk.f32.vlgmr.msra.gmra.mxu0 %vm297_vm2, %v462_v25 }
 0x288   : > { %1623 = vmatprep.mubr.msk.f32.mxu0 %vm1819_vm1, %v1818_v8  ;;  %1622 = vmatpush3.msra.mxu0 %v172_v60 }
 0x289   : > { %1631 = vmatprep.subr.mxu0 %v1818_v8 }
 0x343   : > { %v368_v29 = vpop.f32.mrf.mxu1 }
 0x344   : > { %v372_v32 = vmul.f32 0.17677669, %v368_v29 }
 0x345   : > { %v1605_v33 = vpop.f32.mrf.mxu1 }
 0x346   : > { %v373_v34 = vadd.f32 %v372_v32, %v1959_v31 }
 0x347   : > { %v535_v35 = vpop.f32.mrf.mxu0 }
 0x348   : > { %v539_v36 = vmul.f32 0.17677669, %v535_v35  ;;  %v374_v37 = vsel %vm297_vm2, %v373_v34, -inf }
 0x349   : > { %375 = vmax.xlane.f32.xlu1 %v374_v37  ;;  %v1615_v38 = vpop.f32.mrf.mxu0 }
 0x34a   : > { %v540_v39 = vadd.f32 %v539_v36, %v1959_v31 }
 0x34c   : > { %v541_v40 = vsel %vm297_vm2, %v540_v39, -inf }
 0x34d   : > { %542 = vmax.xlane.f32.xlu0 %v541_v40 }
 0x363   : > { %552 = vrot.lane.b32.xlu0 %v1943_v21, %s1824_s26 }
 0x3d2   : > { %v376_v41 = vpop.xlane.xlu1 %375 }
 0x3d3   : > { %v377_v42 = vsub.f32 %v373_v34, %v376_v41 }
 0x3d5   : > { %v378_v43 = vmul.f32 1.442695, %v377_v42  ;;  %v174_v42 = vld [vmem:[%s2121_s1 + $0x38] sm:$0xff] }
 0x3d6   : > { %v543_v44 = vpop.xlane.xlu0 %542 }
 0x3d7   : > { %1738 = vpow2.f32 %v378_v43  ;;  %v544_v45 = vsub.f32 %v540_v39, %v543_v44 }
 0x3d9   : > { %v545_v46 = vmul.f32 1.442695, %v544_v45 }
 0x3da   : > { %v553_v56 = vpop.permute.xlu0 %552 }
 0x3db   : > { %1740 = vpow2.f32 %v545_v46 }
 0x3e4   : > { %v1739_v47 = vpop.eup %1738 }
 0x3e5   : > { %v380_v48 = vsel %vm297_vm2, %v1739_v47, 0.0 }
 0x3e6   : > { %381 = vadd.xlane.f32.xlu1 %v380_v48 }
 0x3e8   : > { %v1741_v49 = vpop.eup %1740 }
 0x3e9   : > { %v547_v50 = vsel %vm297_vm2, %v1741_v49, 0.0 }
 0x3ea   : > { %548 = vadd.xlane.f32.xlu1 %v547_v50 }
 0x3fb   : > { %385 = vrot.lane.b32.xlu1 %v1943_v21, %s1825_s27 }
 0x3ff   : > { %776 = vrot.lane.b32.xlu1 %v1943_v21, %s1826_s28 }
 0x403   : > { %774 = vrot.lane.b32.xlu1 %v1943_v21, %s1827_s29 }
 0x46f   : > { %v382_v51 = vpop.xlane.xlu1 %381 }
 0x470   : > { %1742 = vrcp.f32 %v382_v51 }
 0x473   : > { %v549_v52 = vpop.xlane.xlu1 %548 }
 0x474   : > { %1744 = vrcp.f32 %v549_v52 }
 0x477   : > { %v386_v53 = vpop.permute.xlu1 %385 }
 0x478   : > { %1607 = vmatpush3.msra.mxu1 %v386_v53 }
 0x479   : > { %1616 = vmatprep.subr.mxu1 %v1818_v8 }
 0x47b   : > { %v777_v62 = vpop.permute.xlu1 %776 }
 0x47d   : > { %v1743_v54 = vpop.eup %1742 }
 0x47e   : > { %v384_v55 = vmul.f32 %v1743_v54, %v1739_v47 }
 0x47f   : > { %v775_v3 = vpop.permute.xlu1 %774 }
 0x480   : > { %1609 = vmatmul.mubr.msk.f32.vlgmr.msra.gmra.mxu1 %vm297_vm2, %v384_v55 }
 0x481   : > { %v1745_v57 = vpop.eup %1744  ;;  %1617 = vmatpush3.msra.mxu1 %v553_v56  ;;  %1618 = vmatprep.mubr.msk.f32.mxu1 %vm1819_vm1, %v1818_v8 }
 0x482   : > { %v551_v58 = vmul.f32 %v1745_v57, %v1741_v49  ;;  %1626 = vmatprep.subr.mxu1 %v1818_v8  ;;  %v1540_v49 = vld [vmem:[%s2122_s2] ss:$0 sm:$0xff] }
 0x484   : > { %1619 = vmatmul.mubr.msk.f32.vlgmr.msra.gmra.mxu1 %vm297_vm2, %v551_v58 }
 0x485   : > { %1628 = vmatprep.mubr.msk.f32.mxu1 %vm1819_vm1, %v1818_v8  ;;  %1627 = vmatpush3.msra.mxu1 %v171_v59 }
 0x486   : > { %1636 = vmatprep.subr.mxu1 %v1818_v8 }
 0x540   : > { %v457_v61 = vpop.f32.mrf.mxu1 }
 0x541   : > { %1629 = vmatmul.mubr.msk.f32.vlgmr.msra.gmra.mxu1 %vm297_vm2, %v457_v61  ;;  %v178_v61 = vld [vmem:[%s2121_s1 + $0x58] sm:$0xff] }
 0x542   : > { %v1610_v63 = vpop.f32.mrf.mxu1  ;;  %1638 = vmatprep.mubr.msk.f32.mxu1 %vm1819_vm1, %v1818_v8 }
 0x543   : > { %v175_v63 = vld [vmem:[%s2121_s1 + $0x40] sm:$0xff] }
 0x544   : > { %v624_v1 = vpop.f32.mrf.mxu1 }
 0x545   : > { %1624 = vmatmul.mubr.msk.f32.vlgmr.msra.gmra.mxu0 %vm297_vm2, %v624_v1  ;;  %v182_v1 = vld [vmem:[%s2121_s1 + $0x78] sm:$0xff] }
 0x546   : > { %1632 = vmatpush3.xpose.msk.msra.mxu0 %vm297_vm2, %v777_v62  ;;  %v1620_v2 = vpop.f32.mrf.mxu1  ;;  %1633 = vmatprep.mubr.msk.f32.mxu0 %vm1819_vm1, %v1818_v8  ;;  %v177_v62 = vld [vmem:[%s2121_s1 + $0x50] sm:$0xff] }
 0x547   : > { %1641 = vmatprep.subr.mxu0 %v1818_v8 }
 0x549   : > { %1634 = vmatmul.mubr.msk.f32.vlgmr.msra.gmra.mxu0 %vm297_vm2, %v775_v3 }
 0x54a   : > { %1643 = vmatprep.mubr.msk.f32.mxu0 %vm1819_vm1, %v1818_v8  ;;  %1642 = vmatpush3.msra.mxu0 %v173_v27 }
 0x54b   : > { %1651 = vmatprep.subr.mxu0 %v1818_v8 }
 0x601   : > { %v770_v4 = vpop.f32.mrf.mxu1 }
 0x603   : > { %v1630_v5 = vpop.f32.mrf.mxu1 }
 0x605   : > { %v697_v6 = vpop.f32.mrf.mxu0 }
 0x606   : > { %v771_v7 = vadd.f32 %v770_v4, %v697_v6  ;;  %v1541_v6 = vld [vmem:[%s2122_s2 + $0x5] ss:$0 sm:$0xff] }
 0x607   : > { %v1625_v9 = vpop.f32.mrf.mxu0 }
 0x608   : > { %v1542_v9 = vld [vmem:[%s2122_s2 + $0x6] ss:$0 sm:$0xff] }
 0x609   : > { %v848_v10 = vpop.f32.mrf.mxu0 }
 0x60a   : > { %v852_v11 = vmul.f32 0.17677669, %v848_v10 }
 0x60b   : > { %v1635_v12 = vpop.f32.mrf.mxu0 }
 0x60c   : > { %v853_v13 = vadd.f32 %v852_v11, %v1959_v31  ;;  %v181_v12 = vld [vmem:[%s2121_s1 + $0x70] sm:$0xff] }
 0x60e   : > { %v854_v14 = vsel %vm297_vm2, %v853_v13, -inf }
 0x60f   : > { %855 = vmax.xlane.f32.xlu1 %v854_v14  ;;  %v179_v14 = vld [vmem:[%s2121_s1 + $0x60] sm:$0xff] }
 0x620   : > { %865 = vrot.lane.b32.xlu1 %v1943_v21, %s1828_s7  ;;  %s1548_s7 = sshll.u32 %s1874_s16, 7  ;;  %s1760_s16 = sshll.u32 %s1832_s24, 4  ;;  %s1761_s16 = int_to_ptr.vmem [resolvable:$false] %s1760_s16 }
 0x621   : > { %s1762_s25 = scalar_lea.vmem %s1761_s16, 256 }
 0x624   : > { %1015 = vrot.lane.b32.xlu1 %v1943_v21, %s1829_s8  ;;  %s161_s8 = scalar_lea.vmem [#allocation2], %s1519_s4 }
 0x698   : > { %v856_v15 = vpop.xlane.xlu1 %855 }
 0x699   : > { %v857_v16 = vsub.f32 %v853_v13, %v856_v15  ;;  %v180_v13 = vld [vmem:[%s2121_s1 + $0x68] sm:$0xff]  ;;  %v1543_v15 = vld [vmem:[%s2122_s2 + $0x1] ss:$0 sm:$0xff] }
 0x69b   : > { %v858_v17 = vmul.f32 1.442695, %v857_v16 }
 0x69c   : > { %v866_v18 = vpop.permute.xlu1 %865 }
 0x69d   : > { %1746 = vpow2.f32 %v858_v17  ;;  %1637 = vmatpush3.msra.mxu1 %v866_v18 }
 0x69e   : > { %1646 = vmatprep.subr.mxu1 %v1818_v8 }
 0x6a0   : > { %v1016_v26 = vpop.permute.xlu1 %1015 }
 0x6aa   : > { %v1747_v19 = vpop.eup %1746 }
 0x6ab   : > { %v860_v20 = vsel %vm297_vm2, %v1747_v19, 0.0 }
 0x6ac   : > { %861 = vadd.xlane.f32.xlu0 %v860_v20  ;;  %v1545_v20 = vld [vmem:[%s2122_s2 + $0x2] ss:$0 sm:$0xff] }
 0x6c2   : > { %1017 = vrot.lane.b32.xlu0 %v1943_v21, %s1830_s9  ;;  %s1456_s9 = sshll.u32 %s161_s8, 4  ;;  %s1457_s9 = int_to_ptr.vmem [resolvable:$true] %s1456_s9 }
 0x6c3   : > { %s1756_s20 = scalar_lea.vmem %s1457_s9, 128  ;;  %p1763_p0 = scmp.lt.s32.totalorder %s1457_s9, %s1761_s16 }
 0x6c4   : > { %p1757_p11 = scmp.ne.s32.totalorder %s1457_s9, %s1756_s20  ;;  %p1764_p1 = scmp.lt.s32.totalorder %s1762_s25, %s1756_s20 }
 0x6c6   : > { %p1758_p12 = pnand %p1757_p11, %p1891_p5  ;;  %p1765_p2 = por %p1764_p1, %p1763_p0 }
 0x6c8   : > { %p1759_p13 = pneg %p1758_p12 }
 0x6ca   : > { %p1766_p3 = pnand %p1765_p2, %p1759_p13 }
 0x735   : > { %v862_v22 = vpop.xlane.xlu0 %861 }
 0x736   : > { %1748 = vrcp.f32 %v862_v22 }
 0x739   : > { %v1018_v25 = vpop.permute.xlu0 %1017 }
 0x743   : > { %v1749_v23 = vpop.eup %1748 }
 0x744   : > { %v864_v24 = vmul.f32 %v1749_v23, %v1747_v19 }
 0x746   : > { %1639 = vmatmul.mubr.msk.f32.vlgmr.msra.gmra.mxu1 %vm297_vm2, %v864_v24 }
 0x747   : > { %1647 = vmatpush3.xpose.msk.msra.mxu1 %vm297_vm2, %v1018_v25  ;;  %1648 = vmatprep.mubr.msk.f32.mxu1 %vm1819_vm1, %v1818_v8 }
 0x748   : > { %1656 = vmatprep.subr.mxu1 %v1818_v8 }
 0x74a   : > { %1649 = vmatmul.mubr.msk.f32.vlgmr.msra.gmra.mxu1 %vm297_vm2, %v1016_v26 }
 0x74b   : > { %1658 = vmatprep.mubr.msk.f32.mxu1 %vm1819_vm1, %v1818_v8  ;;  %1657 = vmatpush3.msra.mxu1 %v174_v42 }
 0x74c   : > { %1672 = vmatprep.subr.mxu1 %v1818_v8 }
 0x806   : > { %v937_v28 = vpop.f32.mrf.mxu1 }
 0x807   : > { %1644 = vmatmul.mubr.msk.f32.vlgmr.msra.gmra.mxu0 %vm297_vm2, %v937_v28 }
 0x808   : > { %v1640_v29 = vpop.f32.mrf.mxu1  ;;  %1653 = vmatprep.mubr.msk.f32.mxu0 %vm1819_vm1, %v1818_v8 }
 0x80a   : > { %v1089_v30 = vpop.f32.mrf.mxu1 }
 0x80b   : > { %v1093_v32 = vmul.f32 0.17677669, %v1089_v30 }
 0x80c   : > { %v1650_v33 = vpop.f32.mrf.mxu1 }
 0x80d   : > { %v1094_v34 = vadd.f32 %v1093_v32, %v1959_v31 }
 0x80f   : > { %v1095_v35 = vsel %vm297_vm2, %v1094_v34, -inf }
 0x810   : > { %1096 = vmax.xlane.f32.xlu1 %v1095_v35 }
 0x899   : > { %v1097_v36 = vpop.xlane.xlu1 %1096 }
 0x89a   : > { %v1098_v37 = vsub.f32 %v1094_v34, %v1097_v36 }
 0x89c   : > { %v1099_v38 = vmul.f32 1.442695, %v1098_v37 }
 0x89e   : > { %1750 = vpow2.f32 %v1099_v38 }
 0x8ab   : > { %v1751_v39 = vpop.eup %1750 }
 0x8ac   : > { %v1101_v40 = vsel %vm297_vm2, %v1751_v39, 0.0 }
 0x8ad   : > { %1102 = vadd.xlane.f32.xlu0 %v1101_v40 }
 0x8c3   : > { %1106 = vrot.lane.b32.xlu0 %v1943_v21, %s1831_s17  ;;  %s1454_s17 = scalar_lea.hbm %s2123_s3, %s1548_s7 }
 0x8c7   : > { %v1010_v41 = vpop.f32.mrf.mxu0 }
 0x8c8   : > { %v1014_v31 = vadd.f32 %v1010_v41, %v771_v7 }
 0x8c9   : > { %v1645_v43 = vpop.f32.mrf.mxu0 }
 0x936   : > { %v1103_v44 = vpop.xlane.xlu0 %1102 }
 0x937   : > { %1752 = vrcp.f32 %v1103_v44 }
 0x93a   : > { %v1107_v45 = vpop.permute.xlu0 %1106 }
 0x93b   : > { %1652 = vmatpush3.msra.mxu0 %v1107_v45 }
 0x93c   : > { %1661 = vmatprep.subr.mxu0 %v1818_v8 }
 0x944   : > { %v1753_v46 = vpop.eup %1752 }
 0x945   : > { %v1105_v47 = vmul.f32 %v1753_v46, %v1751_v39 }
 0x947   : > { %1654 = vmatmul.mubr.msk.f32.vlgmr.msra.gmra.mxu0 %vm297_vm2, %v1105_v47 }
 0x948   : > { %1669 = vmatprep.mubr.msk.f32.mxu0 %vm1819_vm1, %v1818_v8  ;;  %1662 = vmatpush3.msra.mxu0 %v178_v61 }
 0x949   : > { %1663 = vmatprep.subr.mxu0 %v1818_v8 }
 0x94a   : > { %1664 = vmatpush3.msra.mxu0 %v177_v62 }
 0x94b   : > { %1665 = vmatprep.subr.mxu0 %v1818_v8 }
 0xa07   : > { %v1178_v21 = vpop.f32.mrf.mxu0 }
 0xa08   : > { %1659 = vmatmul.mubr.msk.f32.vlgmr.msra.gmra.mxu1 %vm297_vm2, %v1178_v21 }
 0xa09   : > { %v1655_v48 = vpop.f32.mrf.mxu0  ;;  %1680 = vmatprep.mubr.msk.f32.mxu1 %vm1819_vm1, %v1818_v8  ;;  %1673 = vmatpush3.msra.mxu1 %v182_v1 }
 0xa0a   : > { %1674 = vmatprep.subr.mxu1 %v1818_v8 }
 0xa0b   : > { %1675 = vmatpush3.msra.mxu1 %v181_v12 }
 0xa0c   : > { %1676 = vmatprep.subr.mxu1 %v1818_v8 }
 0xa0d   : > { %1677 = vmatpush3.msra.mxu1 %v180_v13 }
 0xa0e   : > { %1678 = vmatprep.subr.mxu1 %v1818_v8 }
 0xa0f   : > { %1679 = vmatpush3.msra.mxu1 %v179_v14 }
 0xac8   : > { %v1251_v50 = vpop.f32.mrf.mxu1 }
 0xac9   : > { %v1255_v51 = vadd.f32 %v1251_v50, %v1014_v31 }
 0xaca   : > { %v1660_v52 = vpop.f32.mrf.mxu1 }
 0xacb   : > { %v1260_v53 = vadd.f32 %v1540_v49, %v1255_v51 }
 0xacd   : > { %v1261_v54 = vadd.f32 %v1260_v53, %v1906_v0  ;;  %v176_v0 = vld [vmem:[%s2121_s1 + $0x48] sm:$0xff] }
 0xace   : > { %1666 = vmatpush3.msra.mxu0 %v176_v0 }
 0xacf   : > { %v1262_v55 = vsel %vm190_vm0, %v1261_v54, 0.0  ;;  %1667 = vmatprep.subr.mxu0 %v1818_v8 }
 0xad0   : > { %1263 = vadd.xlane.f32.xlu1 %v1262_v55  ;;  %1668 = vmatpush3.msra.mxu0 %v175_v63 }
 0xb59   : > { %v1264_v56 = vpop.xlane.xlu1 %1263 }
 0xb5a   : > { %v1265_v57 = vmul.f32 0.03125, %v1264_v56 }
 0xb5c   : > { %v1266_v58 = vsub.f32 %v1261_v54, %v1265_v57 }
 0xb5e   : > { %v1267_v59 = vmul.f32 %v1266_v58, %v1266_v58 }
 0xb60   : > { %v1268_v60 = vsel %vm190_vm0, %v1267_v59, 0.0 }
 0xb61   : > { %1269 = vadd.xlane.f32.xlu1 %v1268_v60 }
 0xbea   : > { %v1270_v2 = vpop.xlane.xlu1 %1269 }
 0xbeb   : > { %v1271_v3 = vmul.f32 0.03125, %v1270_v2 }
 0xbed   : > { %v1272_v4 = vadd.f32 1e-05, %v1271_v3 }
 0xbef   : > { %1754 = vrsqrt.f32 %v1272_v4 }
 0xbfc   : > { %v1755_v5 = vpop.eup %1754 }
 0xbfd   : > { %v1274_v7 = vmul.f32 %v1755_v5, %v1266_v58 }
 0xbff   : > { %v1279_v10 = vmul.f32 %v1541_v6, %v1274_v7 }
 0xc01   : > { %v1284_v11 = vadd.f32 %v1542_v9, %v1279_v10 }
 0xc03   : > { %1670 = vmatmul.mubr.msk.f32.vlgmr.msra.gmra.mxu0 %vm190_vm0, %v1284_v11 }
 0xcc3   : > { %v1358_v16 = vpop.f32.mrf.mxu0 }
 0xcc4   : > { %v1359_v17 = vadd.f32 %v1543_v15, %v1358_v16 }
 0xcc5   : > { %v1671_v18 = vpop.f32.mrf.mxu0 }
 0xcc6   : > { %v1362_v19 = vmax.f32 %v1359_v17, 0.0 }
 0xcc8   : > { %1681 = vmatmul.mubr.msk.f32.vlgmr.msra.gmra.mxu1 %vm190_vm0, %v1362_v19 }
 0xd88   : > { %v1436_v22 = vpop.f32.mrf.mxu1 }
 0xd89   : > { %v1437_v8 = vadd.f32 %v1545_v20, %v1436_v22 }
 0xd8a   : > { %v1682_v23 = vpop.f32.mrf.mxu1 }
 0xd8b   : > { %v1440_v24 = vadd.f32 %v1437_v8, %v1261_v54 }
 0xd8d   : > { %1441 = vst.msk [vmem:[%s161_s8] sm:$0xff] %vm190_vm0, %v1440_v24 }
 0xd8e   : > { %1769 = shalt.err (!%p1766_p3)
}
 0xd8f   : > { %s1770_s26 = scalar_lea.hbm %s1454_s17, 128  ;;  %s1774_s29 = scalar_lea.hbm %s2123_s3, 256 }
 0xd90   : > { %p1771_p4 = scmp.ne.s32.totalorder %s1454_s17, %s1770_s26  ;;  %p1775_p9 = scmp.lt.s32.totalorder %s1454_s17, %s2123_s3 }
 0xd91   : > { %p1776_p10 = scmp.lt.s32.totalorder %s1774_s29, %s1770_s26 }
 0xd92   : > { %p1772_p7 = pnand %p1771_p4, %p1891_p5 }
 0xd93   : > { %p1777_p11 = por %p1776_p10, %p1775_p9 }
 0xd94   : > { %p1773_p8 = pneg %p1772_p7 }
 0xd96   : > { %p1778_p12 = pnand %p1777_p11, %p1773_p8 }
 0xd98   : > { %1781 = shalt.err (!%p1778_p12)
}
 0xd99   : > { %1683 = dma.vmem_to_hbm [thread:$0]  (%p1891_p5), %s1457_s9, 128, %s1454_s17, %s1443_s19  }
 0xd9a PF: > { %p1689_p13 = scmp.ge.s32.totalorder %s1816_s15, 2  ;;  %s1468_s5 = sand.u32 1, %s1804_s12  }
 0xd9b   : > { %s1469_s6 = scalar_lea.sflag [#allocation3], %s1468_s5 }
 0xd9c   : > { %p1686_p0 = pnand %p1689_p13, %p1895_p6 }
 0xd9e   : > { %p1687_p1 = pneg %p1686_p0 }
 0xda0   : > { %1799 = dma.done.wait (%p1687_p1), %s1469_s6, 128  }
 0xda1   : > { %1801 = vsyncadd (%p1687_p1), %s1469_s6, 4294967168  ;;  %p13_p2 = scmp.ge.s32.totalorder %s1878_s18, 4   ;;  %s2126_s12 = smov %s1808_s13 }
 0xda2   : > { %s2127_s13 = smov %s1812_s14  ;;  %s2128_s14 = smov %s1889_s21 }
 0xda3   : > { %s2129_s15 = smov %s1878_s18  ;;  %15 = sbr.rel (!%p13_p2) target bundleno = 3 (0x3), region = 67 }
 0xda8   :  { %1474 = vsyncpa [#allocation3], 1 }
 0xda9   :  { %1476 = vsyncpa [#allocation3 + $0x1], 1 }

</bundles_post_ra>
